<compile_context>
chip_gen: v5e
topology: v5e:2x2
jax: 0.10.0
libtpu: 0.0.40
codegen_flags: <defaults>
</compile_context>

<pallas_src>
import jax
import jax.numpy as jnp
from jax.experimental import pallas as pl
from jax.experimental.pallas import tpu as pltpu


def _round_up(x, m):
    return ((x + m - 1) // m) * m


def _vmem_capacity_bytes():
    """Physical VMEM of the local chip; fall back to v7x's 64 MiB (most constrained)."""
    try:
        info = pltpu.get_tpu_info()
        cap = getattr(info, "vmem_capacity_bytes", None)
        if cap:
            return int(cap)
    except Exception:
        pass
    return 64 << 20


def policy_kernel(x_ref, w1_ref, b1_ref, w2_ref, b2_ref, w3_ref, b3_ref, o_ref):
    """One batch tile, batch on the lane axis.

    x_ref  : (2, TB)   input features on sublanes, batch on lanes
    w1_ref : (H, 2)    fc1 weight, (out, in)
    b1_ref : (H, 1)
    w2_ref : (H, H)    fc2 weight, (out, in); f32 or bf16
    b2_ref : (H, 1)
    w3_ref : (H, 1)    fc3 weight as a column
    b3_ref : (1, 1)    fc3 bias scalar (SMEM)
    o_ref  : (1, TB)   tanh output, batch on lanes
    """
    x = x_ref[...]                                   # (2, TB) f32
    w1 = w1_ref[...]                                 # (H, 2)  f32

    # fc1: K=2 contraction -> two VPU broadcast FMAs (skip the MXU).
    h1 = w1[:, 0:1] * x[0:1, :] + w1[:, 1:2] * x[1:2, :] + b1_ref[...]
    h1 = jnp.maximum(h1, 0.0)                        # (H, TB) f32

    # fc2: (H, H) @ (H, TB) on the MXU, batch stays lane-dense.
    # If the wrapper provided bf16 weights, feed bf16 operands (f32 accumulate).
    h1_mm = h1.astype(w2_ref.dtype)                  # no-op when w2 is f32
    h2 = jnp.dot(w2_ref[...], h1_mm, preferred_element_type=jnp.float32)
    h2 = jnp.maximum(h2 + b2_ref[...], 0.0)          # (H, TB) f32

    # fc3: N=1 output -> VPU multiply + sublane (XLU) reduce; avoids an MXU
    # pass and a 1-lane store. (On v5e, switch to a (1,H)x(H,TB) MXU dot only
    # if the bundle dump shows the single vst slot is the binding resource.)
    h3 = jnp.sum(w3_ref[...] * h2, axis=0, keepdims=True)   # (1, TB)
    o_ref[...] = jnp.tanh(h3 + b3_ref[0, 0]).astype(o_ref.dtype)


def policy_forward_xt(xt, w1, b1, w2, b2, w3, b3, *, fc2_bf16=None, max_tile=32768):
    """Preferred entry: xt is (2, B) float32 (batch on lanes). Returns (1, B).

    Keeping x in this layout upstream avoids the transpose HBM copy that the
    (B, 2) entry point pays (perf review item: wrapper-side transpose/pad).
    """
    B = xt.shape[1]
    H = w1.shape[0]
    if fc2_bf16 is None:
        fc2_bf16 = H >= 128          # bf16 MXU only pays for non-trivial H

    B_pad = _round_up(max(B, 1), 128)

    # --- chip-aware batch-tile selection ---------------------------------
    vmem = _vmem_capacity_bytes()
    # Per-column f32 VMEM: double-buffered x(2 rows)+out(1 row) tiles plus
    # ~3 materialized (H, TB) temporaries (h1, h2, fc3 product).
    bytes_per_col = (2 * (2 + 1) + 3 * H) * 4
    budget = vmem // 2                                  # ~50% headroom
    tb_cap = max(128, (budget // bytes_per_col) // 128 * 128)
    tb_cap = min(tb_cap, max_tile)

    if B_pad <= tb_cap:
        TB = B_pad
        if B_pad >= 256:
            # Guarantee >= 2 grid tiles so v7x's 2nd TensorCore is not idle.
            TB = _round_up(B_pad // 2, 128)
    else:
        TB = tb_cap
    B_pad = _round_up(B_pad, TB)

    if B_pad != B:
        xt = jnp.pad(xt, ((0, 0), (0, B_pad - B)))      # lane-axis pad only

    b1c = b1.reshape(H, 1)
    b2c = b2.reshape(H, 1)
    w2k = w2.astype(jnp.bfloat16) if fc2_bf16 else w2   # resident copy already bf16
    w3c = w3.reshape(1, H).T                            # (H, 1)
    b3s = b3.reshape(1, 1)

    resident = lambda i: (0, 0)                         # weights stay in VMEM
    grid = (B_pad // TB,)

    flops = int(B_pad) * (2 * 2 * H + 2 * H * H + 2 * H)
    bytes_accessed = int(B_pad) * 3 * 4 + (2 * H + H + H * H + H + H + 1) * 4

    out = pl.pallas_call(
        policy_kernel,
        out_shape=jax.ShapeDtypeStruct((1, B_pad), jnp.float32),
        grid=grid,
        in_specs=[
            pl.BlockSpec((2, TB), lambda i: (0, i)),                     # x (tiled)
            pl.BlockSpec((H, 2), resident),                              # w1
            pl.BlockSpec((H, 1), resident),                              # b1
            pl.BlockSpec((H, H), resident),                              # w2
            pl.BlockSpec((H, 1), resident),                              # b2
            pl.BlockSpec((H, 1), resident),                              # w3
            pl.BlockSpec(memory_space=pltpu.MemorySpace.SMEM),           # b3 scalar
        ],
        out_specs=pl.BlockSpec((1, TB), lambda i: (0, i)),
        compiler_params=pltpu.CompilerParams(
            dimension_semantics=("parallel",),
            vmem_limit_bytes=min(int(vmem * 3 // 4), 128 << 20),
        ),
        cost_estimate=pl.CostEstimate(
            flops=flops, transcendentals=int(B_pad), bytes_accessed=bytes_accessed),
    )(xt, w1, b1c, w2k, b2c, w3c, b3s)

    return out[:, :B]


def policy_forward(x, w1, b1, w2, b2, w3, b3, **kw):
    """PyTorch-compatible entry: x (B, 2) float32 -> (B, 1) float32.

    Note: the transpose here is one extra HBM pass over x; callers that can
    keep x in (2, B) layout should use policy_forward_xt directly.
    """
    out = policy_forward_xt(jnp.transpose(x), w1, b1, w2, b2, w3, b3, **kw)
    return jnp.transpose(out)                           # (B, 1)


def init_params(key, hidden):
    """nn.Linear-style init U(-1/sqrt(fan_in), 1/sqrt(fan_in)), (out, in) layout."""
    ks = jax.random.split(key, 6)

    def linear(kw, kb, fan_in, fan_out):
        bound = 1.0 / (fan_in ** 0.5)
        w = jax.random.uniform(kw, (fan_out, fan_in), jnp.float32, -bound, bound)
        b = jax.random.uniform(kb, (fan_out,), jnp.float32, -bound, bound)
        return w, b

    w1, b1 = linear(ks[0], ks[1], 2, hidden)
    w2, b2 = linear(ks[2], ks[3], hidden, hidden)
    w3, b3 = linear(ks[4], ks[5], hidden, 1)
    return w1, b1, w2, b2, w3, b3


def reference_forward(x, w1, b1, w2, b2, w3, b3):
    h1 = jnp.maximum(x @ w1.T + b1, 0.0)
    h2 = jnp.maximum(h1 @ w2.T + b2, 0.0)
    return jnp.tanh(h2 @ w3.T + b3)


# TODO(synk): Policy.step / decorder / load_models are host-side Python
# (Fraction arithmetic, sampling loop, torch.load) and are not part of the
# tensor forward pass, so they are intentionally not ported to Pallas.

if __name__ == "__main__":
    key = jax.random.PRNGKey(0)
    k_x, k_x2, k_p = jax.random.split(key, 3)

    hidden = 32
    params = init_params(k_p, hidden)

    # Small batch (single 128-wide tile after padding).
    batch = 8
    x = jax.random.uniform(k_x, (batch, 2), jnp.float32)  # state = [remaining/100, recip sum]
    out = jax.block_until_ready(policy_forward(x, *params))
    ref = reference_forward(x, *params)
    assert out.shape == (batch, 1)
    assert jnp.allclose(out, ref, atol=1e-5, rtol=1e-5)

    # Larger batch: exercises lane padding and the >=2-tile (v7x megacore) path.
    batch2 = 300
    x2 = jax.random.uniform(k_x2, (batch2, 2), jnp.float32)
    out2 = jax.block_until_ready(policy_forward(x2, *params))
    ref2 = reference_forward(x2, *params)
    assert out2.shape == (batch2, 1)
    assert jnp.allclose(out2, ref2, atol=1e-5, rtol=1e-5)

    print("KERNEL_OK")
</pallas_src>

<mosaic_0001>
module attributes {stable_mosaic.version = 11 : i64} {
  func.func @policy_kernel(%arg0: i32, %arg1: memref<2x128xf32, #tpu.memory_space<vmem>>, %arg2: memref<32x2xf32, #tpu.memory_space<vmem>>, %arg3: memref<32x1xf32, #tpu.memory_space<vmem>>, %arg4: memref<32x32xf32, #tpu.memory_space<vmem>>, %arg5: memref<32x1xf32, #tpu.memory_space<vmem>>, %arg6: memref<32x1xf32, #tpu.memory_space<vmem>>, %arg7: memref<1x1xf32, #tpu.memory_space<smem>>, %arg8: memref<1x128xf32, #tpu.memory_space<vmem>>) attributes {dimension_semantics = [#tpu.dimension_semantics<parallel>], iteration_bounds = array<i64: 1>, scalar_prefetch = 0 : i64, scratch_operands = 0 : i64, tpu.core_type = #tpu.core_type<tc>, window_params = [{transform_indices = @transform_0, window_bounds = array<i64: 2, 128>}, {pipeline_mode = #tpu.pipeline_mode<synchronous>, transform_indices = @transform_1, window_bounds = array<i64: 32, 2>}, {pipeline_mode = #tpu.pipeline_mode<synchronous>, transform_indices = @transform_2, window_bounds = array<i64: 32, 1>}, {pipeline_mode = #tpu.pipeline_mode<synchronous>, transform_indices = @transform_3, window_bounds = array<i64: 32, 32>}, {pipeline_mode = #tpu.pipeline_mode<synchronous>, transform_indices = @transform_4, window_bounds = array<i64: 32, 1>}, {pipeline_mode = #tpu.pipeline_mode<synchronous>, transform_indices = @transform_5, window_bounds = array<i64: 32, 1>}, {transform_indices = @transform_6, window_bounds = array<i64: 1, 1>}, {transform_indices = @transform_7, window_bounds = array<i64: 1, 128>}]} {
    %c0 = arith.constant 0 : index
    %c0_0 = arith.constant 0 : index
    %0 = vector.load %arg1[%c0, %c0_0] : memref<2x128xf32, #tpu.memory_space<vmem>>, vector<2x128xf32>
    %c0_1 = arith.constant 0 : index
    %c0_2 = arith.constant 0 : index
    %1 = vector.load %arg2[%c0_1, %c0_2] : memref<32x2xf32, #tpu.memory_space<vmem>>, vector<32x2xf32>
    %2 = vector.extract_strided_slice %1 {offsets = [0, 0], sizes = [32, 1], strides = [1, 1]} : vector<32x2xf32> to vector<32x1xf32>
    %3 = vector.extract_strided_slice %0 {offsets = [0, 0], sizes = [1, 128], strides = [1, 1]} : vector<2x128xf32> to vector<1x128xf32>
    %4 = vector.broadcast %2 : vector<32x1xf32> to vector<32x128xf32>
    %5 = vector.broadcast %3 : vector<1x128xf32> to vector<32x128xf32>
    %6 = arith.mulf %4, %5 : vector<32x128xf32>
    %7 = vector.extract_strided_slice %1 {offsets = [0, 1], sizes = [32, 1], strides = [1, 1]} : vector<32x2xf32> to vector<32x1xf32>
    %8 = vector.extract_strided_slice %0 {offsets = [1, 0], sizes = [1, 128], strides = [1, 1]} : vector<2x128xf32> to vector<1x128xf32>
    %9 = vector.broadcast %7 : vector<32x1xf32> to vector<32x128xf32>
    %10 = vector.broadcast %8 : vector<1x128xf32> to vector<32x128xf32>
    %11 = arith.mulf %9, %10 : vector<32x128xf32>
    %12 = arith.addf %6, %11 : vector<32x128xf32>
    %c0_3 = arith.constant 0 : index
    %c0_4 = arith.constant 0 : index
    %13 = vector.load %arg3[%c0_3, %c0_4] : memref<32x1xf32, #tpu.memory_space<vmem>>, vector<32x1xf32>
    %14 = vector.broadcast %13 : vector<32x1xf32> to vector<32x128xf32>
    %15 = arith.addf %12, %14 : vector<32x128xf32>
    %cst = arith.constant 0.000000e+00 : f32
    %16 = vector.broadcast %cst : f32 to vector<32x128xf32>
    %17 = arith.maximumf %15, %16 : vector<32x128xf32>
    %c0_5 = arith.constant 0 : index
    %c0_6 = arith.constant 0 : index
    %18 = vector.load %arg4[%c0_5, %c0_6] : memref<32x32xf32, #tpu.memory_space<vmem>>, vector<32x32xf32>
    %cst_7 = arith.constant dense<0.000000e+00> : vector<32x128xf32>
    %19 = tpu.matmul %18, %17, %cst_7 {dimension_numbers = #tpu.dot_dimension_numbers<[1], [0], [0], [1], [0, 0, 1, 1], [], []>} : vector<32x32xf32>, vector<32x128xf32>, vector<32x128xf32> -> vector<32x128xf32>
    %c0_8 = arith.constant 0 : index
    %c0_9 = arith.constant 0 : index
    %20 = vector.load %arg5[%c0_8, %c0_9] : memref<32x1xf32, #tpu.memory_space<vmem>>, vector<32x1xf32>
    %21 = vector.broadcast %20 : vector<32x1xf32> to vector<32x128xf32>
    %22 = arith.addf %19, %21 : vector<32x128xf32>
    %cst_10 = arith.constant 0.000000e+00 : f32
    %23 = vector.broadcast %cst_10 : f32 to vector<32x128xf32>
    %24 = arith.maximumf %22, %23 : vector<32x128xf32>
    %c0_11 = arith.constant 0 : index
    %c0_12 = arith.constant 0 : index
    %25 = vector.load %arg6[%c0_11, %c0_12] : memref<32x1xf32, #tpu.memory_space<vmem>>, vector<32x1xf32>
    %26 = vector.broadcast %25 : vector<32x1xf32> to vector<32x128xf32>
    %27 = arith.mulf %26, %24 : vector<32x128xf32>
    %cst_13 = arith.constant dense<0.000000e+00> : vector<128xf32>
    %28 = vector.multi_reduction <add>, %27, %cst_13 [0] : vector<32x128xf32> to vector<128xf32>
    %29 = vector.shape_cast %28 : vector<128xf32> to vector<1x128xf32>
    %c0_14 = arith.constant 0 : index
    %c0_15 = arith.constant 0 : index
    %30 = memref.load %arg7[%c0_14, %c0_15] : memref<1x1xf32, #tpu.memory_space<smem>>
    %31 = vector.broadcast %30 : f32 to vector<1x128xf32>
    %32 = arith.addf %29, %31 : vector<1x128xf32>
    %33 = math.tanh %32 : vector<1x128xf32>
    %c0_16 = arith.constant 0 : index
    %c0_17 = arith.constant 0 : index
    %34 = vector.load %arg8[%c0_16, %c0_17] : memref<1x128xf32, #tpu.memory_space<vmem>>, vector<1x128xf32>
    tpu.vector_store %arg8[%c0_16, %c0_17], %33 {strides = array<i32>} : memref<1x128xf32, #tpu.memory_space<vmem>>, vector<1x128xf32>,
    return
  }
  func.func @transform_0(%arg0: i32) -> (i32, i32) {
    %c0_i32 = arith.constant 0 : i32
    %c0_i32_0 = arith.constant 0 : i32
    return %c0_i32, %arg0 : i32, i32
  }
  func.func @transform_1(%arg0: i32) -> (i32, i32) {
    %c0_i32 = arith.constant 0 : i32
    %c0_i32_0 = arith.constant 0 : i32
    %c0_i32_1 = arith.constant 0 : i32
    return %c0_i32, %c0_i32_0 : i32, i32
  }
  func.func @transform_2(%arg0: i32) -> (i32, i32) {
    %c0_i32 = arith.constant 0 : i32
    %c0_i32_0 = arith.constant 0 : i32
    %c0_i32_1 = arith.constant 0 : i32
    return %c0_i32, %c0_i32_0 : i32, i32
  }
  func.func @transform_3(%arg0: i32) -> (i32, i32) {
    %c0_i32 = arith.constant 0 : i32
    %c0_i32_0 = arith.constant 0 : i32
    %c0_i32_1 = arith.constant 0 : i32
    return %c0_i32, %c0_i32_0 : i32, i32
  }
  func.func @transform_4(%arg0: i32) -> (i32, i32) {
    %c0_i32 = arith.constant 0 : i32
    %c0_i32_0 = arith.constant 0 : i32
    %c0_i32_1 = arith.constant 0 : i32
    return %c0_i32, %c0_i32_0 : i32, i32
  }
  func.func @transform_5(%arg0: i32) -> (i32, i32) {
    %c0_i32 = arith.constant 0 : i32
    %c0_i32_0 = arith.constant 0 : i32
    %c0_i32_1 = arith.constant 0 : i32
    return %c0_i32, %c0_i32_0 : i32, i32
  }
  func.func @transform_6(%arg0: i32) -> (i32, i32) {
    %c0_i32 = arith.constant 0 : i32
    %c0_i32_0 = arith.constant 0 : i32
    %c0_i32_1 = arith.constant 0 : i32
    return %c0_i32, %c0_i32_0 : i32, i32
  }
  func.func @transform_7(%arg0: i32) -> (i32, i32) {
    %c0_i32 = arith.constant 0 : i32
    %c0_i32_0 = arith.constant 0 : i32
    return %c0_i32, %arg0 : i32, i32
  }
}

</mosaic_0001>

<bundles_post_ra>
// kernel: tpu_custom_call.1
= control target key start
LH: loop header
LB: loop body
LE: loop exit
PB: predicated region body
PF: predicated region fallthrough
CT: control target
= control target key end

     0   :  { %v303_v3 = vmov 0   ;;  %s415_s0 = inlined_call_operand.vmem [shape: f32[2,128], index: 0, kind: input, shape index: {}]   ;;  %s416_s1 = inlined_call_operand.vmem [shape: f32[32,2], index: 1, kind: input, shape index: {}]   ;;  %s417_s2 = inlined_call_operand.vmem [shape: f32[32,1], index: 2, kind: input, shape index: {}]   ;;  %s418_s3 = inlined_call_operand.vmem [shape: f32[32,32], index: 3, kind: input, shape index: {}]   ;;  %s419_s4 = inlined_call_operand.vmem [shape: f32[32,1], index: 4, kind: input, shape index: {}]   ;;  %s420_s5 = inlined_call_operand.vmem [shape: f32[32,1], index: 5, kind: input, shape index: {}]   ;;  %s421_s6 = inlined_call_operand.<no memory space> [shape: f32[1,1], index: 6, kind: input, shape index: {}]   ;;  %s422_s7 = inlined_call_operand.hbm [shape: f32[1,128], index: 7, kind: output, shape index: {}]  }
   0x1   :  { %v32_v0 = vld [vmem:[%s416_s1 + $0x18] sm:$0xff]  ;;  %v31_v1 = vld [vmem:[%s416_s1 + $0x10] sm:$0xff]  ;;  %v30_v2 = vld [vmem:[%s416_s1 + $0x8] sm:$0xff]  ;;  %270 = vset.pattern.permute.xlu2 %v303_v3  ;;  %268 = vset.pattern.permute.xlu1 %v303_v3 }
   0x2   :  { %266 = vset.pattern.permute.xlu0 %v303_v3  ;;  %45 = vperm.xlu1 %268, %v31_v1  }
   0x3   :  { %50 = vperm.xlu0 %266, %v32_v0   ;;  %40 = vperm.xlu2 %270, %v30_v2  }
   0x4   :  { %13 = vsyncpa [#allocation4], 0  ;;  %v304_v4 = vmov 1   ;;  %v29_v5 = vld [vmem:[%s416_s1] sm:$0xff]  ;;  %v86_v6 = vld [vmem:[%s417_s2 + $0x18] sm:$0xff]  ;;  %vm143_vm0 = vcmask 261120  }
   0x5   :  { %v85_v7 = vld [vmem:[%s417_s2 + $0x10] sm:$0xff]  ;;  %v83_v8 = vld [vmem:[%s417_s2] sm:$0xff]  ;;  %v84_v9 = vld [vmem:[%s417_s2 + $0x8] sm:$0xff]  ;;  %s305_s16 = smov [#allocation3]   ;;  %s238_s19 = sshll.u32 %s422_s7, 4  ;;  %s239_s19 = int_to_ptr.hbm [resolvable:$true] %s238_s19 }
   0x6   :  { %v119_v10 = vld [vmem:[%s419_s4] sm:$0xff]  ;;  %v120_v12 = vld [vmem:[%s419_s4 + $0x8] sm:$0xff]  ;;  %v121_v13 = vld [vmem:[%s419_s4 + $0x10] sm:$0xff]  ;;  %s236_s1 = sshll.u32 %s305_s16, 4  ;;  %s237_s1 = int_to_ptr.vmem [resolvable:$true] %s236_s1 }
   0x7   :  { %v189_v11 = vld [vmem:[%s420_s5] sm:$0xff]  ;;  %v192_v14 = vld [vmem:[%s420_s5 + $0x18] sm:$0xff]  ;;  %v190_v16 = vld [vmem:[%s420_s5 + $0x8] sm:$0xff] }
   0x8   :  { %v122_v15 = vld [vmem:[%s419_s4 + $0x18] sm:$0xff]  ;;  %v191_v17 = vld [vmem:[%s420_s5 + $0x10] sm:$0xff]  ;;  %v28_v24 = vld [vmem:[%s415_s0] sm:$0x3] }
   0x9   :  { %v74_v25 = vperm.slane %v28_v24, 1  ;;  %v53_v26 = vperm.slane %v28_v24, 0  ;;  %v115_v53 = vld [vmem:[%s418_s3] sm:$0xff]  ;;  %v116_v54 = vld [vmem:[%s418_s3 + $0x8] sm:$0xff]  ;;  %v117_v55 = vld [vmem:[%s418_s3 + $0x10] sm:$0xff] }
   0xa   :  { %269 = vset.pattern.permute.xlu1 %v304_v4  ;;  %v118_v56 = vld [vmem:[%s418_s3 + $0x18] sm:$0xff] }
   0xb   :  { %267 = vset.pattern.permute.xlu0 %v304_v4  ;;  %271 = vset.pattern.permute.xlu2 %v304_v4 }
   0xc   :  { %71 = vperm.xlu0 %267, %v32_v0   ;;  %67 = vperm.xlu1 %269, %v31_v1  }
   0xd   :  { %63 = vperm.xlu2 %271, %v30_v2  }
  0x14   :  { %272 = vset.pattern.permute.xlu1 %v303_v3  ;;  %59 = vperm.xlu0 %267, %v29_v5  }
  0x15   :  { %273 = vset.pattern.permute.xlu2 %v303_v3  ;;  %104 = vperm.xlu1 %272, %v86_v6  }
  0x16   :  { %35 = vperm.xlu2 %273, %v29_v5  }
  0x1c   :  { %274 = vset.pattern.permute.xlu0 %v303_v3 }
  0x1d   :  { %99 = vperm.xlu1 %272, %v85_v7   ;;  %89 = vperm.xlu0 %274, %v83_v8  }
  0x1e   :  { %94 = vperm.xlu2 %273, %v84_v9  }
  0x25   :  { %125 = vperm.xlu1 %272, %v119_v10   ;;  %195 = vperm.xlu0 %274, %v189_v11  }
  0x26   :  { %130 = vperm.xlu2 %273, %v120_v12  }
  0x2d   :  { %135 = vperm.xlu1 %272, %v121_v13   ;;  %210 = vperm.xlu0 %274, %v192_v14  }
  0x2e   :  { %140 = vperm.xlu2 %273, %v122_v15  }
  0x35   :  { %200 = vperm.xlu1 %272, %v190_v16  }
  0x36   :  { %205 = vperm.xlu2 %273, %v191_v17  }
  0x5d   :  { %v41_v18 = vpop.permute.xlu2 %40 }
  0x5e   :  { %v55_v32 = vmul.f32 %v53_v26, %v41_v18 }
  0x67   :  { %v64_v21 = vpop.permute.xlu2 %63 }
  0x68   :  { %v76_v33 = vmul.f32 %v74_v25, %v64_v21 }
  0x6a   :  { %v80_v38 = vadd.f32 %v76_v33, %v55_v32 }
  0x70   :  { %v36_v28 = vpop.permute.xlu2 %35 }
  0x71   :  { %v54_v39 = vmul.f32 %v53_v26, %v36_v28 }
  0x74   :  { %v46_v19 = vpop.permute.xlu1 %45 }
  0x75   :  { %v51_v20 = vpop.permute.xlu0 %50  ;;  %v56_v40 = vmul.f32 %v53_v26, %v46_v19 }
  0x76   :  { %v57_v29 = vmul.f32 %v53_v26, %v51_v20 }
  0x78   :  { %v95_v42 = vpop.permute.xlu2 %94 }
  0x79   :  { %v108_v46 = vadd.f32 %v95_v42, %v80_v38 }
  0x7b   :  { %v112_v51 = vmax.f32 %v108_v46, 0.0 }
  0x7e   :  { %v72_v22 = vpop.permute.xlu0 %71  ;;  %v68_v23 = vpop.permute.xlu1 %67 }
  0x7f   :  { %v78_v27 = vmul.f32 %v74_v25, %v72_v22  ;;  %v77_v36 = vmul.f32 %v74_v25, %v68_v23 }
  0x80   :  { %v131_v58 = vpop.permute.xlu2 %130 }
  0x81   :  { %v82_v31 = vadd.f32 %v78_v27, %v57_v29  ;;  %v81_v43 = vadd.f32 %v77_v36, %v56_v40 }
  0x86   :  { %v60_v30 = vpop.permute.xlu0 %59 }
  0x87   :  { %v105_v34 = vpop.permute.xlu1 %104  ;;  %v75_v41 = vmul.f32 %v74_v25, %v60_v30  ;;  %v227_v25 = vstv %s421_s6 }
  0x88   :  { %v110_v35 = vadd.f32 %v105_v34, %v82_v31  ;;  %v141_v62 = vpop.permute.xlu2 %140 }
  0x89   :  { %v79_v48 = vadd.f32 %v75_v41, %v54_v39 }
  0x8a   :  { %v114_v37 = vmax.f32 %v110_v35, 0.0 }
  0x8c   :  { %168 = vmatpush.msra.mxu0 %v114_v37  ;;  %251 = vmatpush.msra.mxu1 %v114_v37 }
  0x8d   :  { %252 = vmatpush.msra.mxu2 %v114_v37  ;;  %253 = vmatpush.msra.mxu3 %v114_v37 }
  0x8f   :  { %v100_v44 = vpop.permute.xlu1 %99  ;;  %v90_v45 = vpop.permute.xlu0 %89 }
  0x90   :  { %v109_v47 = vadd.f32 %v100_v44, %v81_v43  ;;  %v107_v50 = vadd.f32 %v90_v45, %v79_v48  ;;  %v206_v13 = vpop.permute.xlu2 %205 }
  0x92   :  { %v113_v49 = vmax.f32 %v109_v47, 0.0  ;;  %v111_v52 = vmax.f32 %v107_v50, 0.0 }
  0x94   :  { %169 = vmatpush.msra.mxu0 %v113_v49  ;;  %254 = vmatpush.msra.mxu1 %v113_v49 }
  0x95   :  { %255 = vmatpush.msra.mxu2 %v113_v49  ;;  %256 = vmatpush.msra.mxu3 %v113_v49 }
  0x96   :  { %170 = vmatpush.msra.mxu0 %v112_v51  ;;  %257 = vmatpush.msra.mxu1 %v112_v51 }
  0x97   :  { %258 = vmatpush.msra.mxu2 %v112_v51  ;;  %259 = vmatpush.msra.mxu3 %v112_v51  ;;  %v126_v57 = vpop.permute.xlu1 %125  ;;  %v196_v1 = vpop.permute.xlu0 %195 }
  0x98   :  { %171 = vmatpush.msra.mxu0 %v111_v52  ;;  %260 = vmatpush.msra.mxu1 %v111_v52 }
  0x99   :  { %261 = vmatpush.msra.mxu2 %v111_v52  ;;  %262 = vmatpush.msra.mxu3 %v111_v52 }
  0x9a   :  { %247 = vmatmul.msk.f32.vlgmr.msra.gmra.mxu0 %vm143_vm0, %v115_v53  ;;  %248 = vmatmul.msk.f32.vlgmr.msra.gmra.mxu1 %vm143_vm0, %v116_v54 }
  0x9b   :  { %249 = vmatmul.msk.f32.vlgmr.msra.gmra.mxu2 %vm143_vm0, %v117_v55  ;;  %250 = vmatmul.msk.f32.vlgmr.msra.gmra.mxu3 %vm143_vm0, %v118_v56 }
  0x9f   :  { %v136_v59 = vpop.permute.xlu1 %135  ;;  %v211_v16 = vpop.permute.xlu0 %210 }
  0xa7   :  { %v201_v4 = vpop.permute.xlu1 %200 }
 0x117   :  { %v173_v60 = vpop.f32.mrf.mxu0  ;;  %v176_v61 = vpop.f32.mrf.mxu1 }
 0x118   :  { %v174_v63 = vadd.f32 %v173_v60, %v126_v57  ;;  %v177_v0 = vadd.f32 %v176_v61, %v131_v58 }
 0x11a   :  { %v185_v2 = vmax.f32 %v174_v63, 0.0  ;;  %v186_v3 = vmax.f32 %v177_v0, 0.0 }
 0x11c   :  { %v213_v7 = vmul.f32 %v196_v1, %v185_v2  ;;  %v214_v8 = vmul.f32 %v201_v4, %v186_v3 }
 0x11e   :  { %v179_v5 = vpop.f32.mrf.mxu2  ;;  %v182_v6 = vpop.f32.mrf.mxu3  ;;  %v217_v14 = vadd.f32 %v214_v8, %v213_v7 }
 0x11f   :  { %v180_v9 = vadd.f32 %v179_v5, %v136_v59  ;;  %v183_v10 = vadd.f32 %v182_v6, %v141_v62 }
 0x121   :  { %v187_v11 = vmax.f32 %v180_v9, 0.0  ;;  %v188_v12 = vmax.f32 %v183_v10, 0.0 }
 0x123   :  { %v215_v15 = vmul.f32 %v206_v13, %v187_v11  ;;  %v216_v18 = vmul.f32 %v211_v16, %v188_v12 }
 0x125   :  { %v218_v17 = vadd.f32 %v217_v14, %v215_v15 }
 0x127   :  { %v219_v19 = vadd.f32 %v218_v17, %v216_v18 }
 0x129   :  { %v220_v20 = vrot.slane %v219_v19, 4 }
 0x12b   :  { %v221_v21 = vadd.f32 %v220_v20, %v219_v19 }
 0x12d   :  { %v222_v22 = vrot.slane %v221_v21, 2 }
 0x12f   :  { %v223_v23 = vadd.f32 %v222_v22, %v221_v21 }
 0x131   :  { %v224_v24 = vrot.slane %v223_v23, 1 }
 0x133   :  { %v225_v26 = vadd.f32 %v224_v24, %v223_v23 }
 0x135   :  { %v228_v27 = vadd.f32 %v227_v25, %v225_v26 }
 0x137   :  { %275 = vtanh.f32 %v228_v27 }
 0x13d   :  { %v276_v28 = vpop.eup %275 }
 0x13e   :  { %230 = vst [vmem:[#allocation3] sm:$0x1] %v276_v28 }
 0x13f   :  { %241 = dma.vmem_to_hbm [thread:$0]  %s237_s1, 16, %s239_s19, [#allocation4]  }
 0x140   :  { %301 = dma.done.wait [#allocation4], 16  }
 0x141   :  { %302 = vsyncadd [#allocation4], 4294967280 }
 0x142   :  { %246 = vsyncpa [#allocation4], 1 }

</bundles_post_ra>
